<compile_context>
chip_gen: v7x
topology: tpu7x:2x2x1
jax: 0.10.0
libtpu: 0.0.40
codegen_flags: <defaults>
</compile_context>

<pallas_src>
import jax
import jax.numpy as jnp
from jax import lax
from jax.experimental import pallas as pl
from jax.experimental.pallas import tpu as pltpu

INF = 10000.0        # finite sentinel, matches the PyTorch module
NEG_PAD = -1.0e30    # only for lane-padding columns (exp underflows to 0)


def assign_kernel(sp_ref, de_ref, m0_ref, k1_ref, f1_ref,
                  wsp_ref, wde_ref, bsp_ref, bde_ref, out_ref, c_scr):
    cdt = sp_ref.dtype  # compute dtype of the attention matmul (bf16 or f32)

    # Dense-side 1x1 conv projection: computed once per batch block (n == 0),
    # cached in VMEM scratch and reused for every N tile of this batch.
    @pl.when(pl.program_id(1) == 0)
    def _():
        c = jnp.dot(wde_ref[...], de_ref[0],
                    preferred_element_type=jnp.float32)          # (D, Mp)
        c_scr[...] = (c + bde_ref[...]).astype(cdt)

    # Sparse-side projection for this N tile (scale/temp folded into wsp/bsp).
    a = jnp.dot(wsp_ref[...], sp_ref[0],
                preferred_element_type=jnp.float32)              # (D, tn)
    a = (a + bsp_ref[...]).astype(cdt)

    # raw_attn[n, m] = sum_d a[d, n] * c[d, m]   (A^T B form on the MXU)
    attn = lax.dot_general(a, c_scr[...], (((0,), (0,)), ((), ())),
                           preferred_element_type=jnp.float32)   # (tn, Mp)

    # Single fused masked_fill (replace, not add) matching PyTorch exactly:
    #   fill = -INF for real masked columns, NEG_PAD for lane padding.
    keep = jnp.logical_and(m0_ref[0] > 0.5, k1_ref[0] > 0.5)     # (tn, Mp)
    attn = jnp.where(keep, attn, f1_ref[0])

    # softmax over the last (M) axis, in f32.
    mx = jnp.max(attn, axis=-1, keepdims=True)
    e = jnp.exp(attn - mx)
    s = jnp.sum(e, axis=-1, keepdims=True)
    out_ref[0] = (e * pl.reciprocal(s, approx=True)).astype(out_ref.dtype)


def _vmem_capacity_bytes():
    try:
        return int(pltpu.get_tpu_info().vmem_capacity_bytes)
    except Exception:
        return 64 * 1024 * 1024   # conservative (v7x per-TC physical VMEM)


def _vmem_estimate(tn, d, mp, esize, osize):
    """Rough per-step VMEM working set (double-buffered blocks + temporaries)."""
    b = 2 * d * tn * esize          # sparse block
    b += 2 * d * mp * esize         # dense block
    b += 2 * tn * mp * osize        # output block
    b += 2 * 2 * d * d * esize      # two weight blocks
    b += d * mp * esize             # dense-projection scratch
    b += 3 * tn * mp * 4            # f32 temporaries (attn, e, keep)
    b += 4 * d * tn * 4             # projection temporaries
    b += 4 * (tn + 2 * mp + d)      # masks / fill / biases
    return b


def _choose_tn(n, d, mp, esize, osize, budget):
    """Largest N tile that fits the VMEM budget.  Tiles must be multiples of
    128 (lane constraint on the (B, D, N) input block) or the full N."""
    def fits(tn):
        return _vmem_estimate(tn, d, mp, esize, osize) <= budget
    if fits(n):
        return n
    top = (n // 128) * 128
    for tn in range(top, 0, -128):
        if n % tn == 0 and fits(tn):
            return tn
    # Nothing fits cleanly: best-effort smallest legal tile, else full N.
    for tn in range(128, n, 128):
        if n % tn == 0:
            return tn
    return n


def assign_forward(sparse, dense, mask0, mask1, weight, bias, *, temp,
                   out_dtype=None, unpad=True):
    """sparse: (B, D, N), dense: (B, D, M), mask0: (B, N) bool, mask1: (B, M) bool.

    weight: (D, D) (Conv1d weight with k=1 squeezed), bias: (D,).
    Compute dtype follows sparse.dtype (pass bf16 inputs for bf16 MXU matmuls);
    output dtype follows the compute dtype unless `out_dtype` is given.
    """
    B, D, N = sparse.shape
    M = dense.shape[2]
    cdt = sparse.dtype
    if out_dtype is None:
        out_dtype = cdt
    if mask0 is None:
        mask0 = jnp.ones((B, N), dtype=bool)
    if mask1 is None:
        mask1 = jnp.ones((B, M), dtype=bool)

    scale = (float(D) ** (-0.5)) / float(temp)
    Mp = ((M + 127) // 128) * 128          # lane-dense output width

    # VMEM / generation-aware tile selection + explicit scoped-VMEM limit.
    cap = _vmem_capacity_bytes()
    esize = jnp.dtype(cdt).itemsize
    osize = jnp.dtype(out_dtype).itemsize
    tn = _choose_tn(N, D, Mp, esize, osize, budget=int(0.45 * cap))
    # v7x has 2 TensorCores: keep >= 2 "parallel" grid steps for single-batch calls.
    if B == 1 and tn == N and N % 256 == 0:
        tn = N // 2
    gn = N // tn
    vlim = int(min(0.9 * cap,
                   max(1.25 * _vmem_estimate(tn, D, Mp, esize, osize),
                       32 * 1024 * 1024)))

    # Conv1d(k=1) == W @ x + b; fold scale/temp into the sparse-side params.
    w_sp = (weight * scale).astype(cdt)                    # (D_out, D_in)
    w_de = weight.astype(cdt)
    b_sp = (bias * scale).reshape(D, 1).astype(jnp.float32)
    b_de = bias.reshape(D, 1).astype(jnp.float32)

    # Native NCW layout; only dense's last dim gets lane-padded (and only if needed).
    sp = sparse.astype(cdt)
    de = dense.astype(cdt)
    if Mp != M:
        de = jnp.pad(de, ((0, 0), (0, 0), (0, Mp - M)))

    m0 = mask0.astype(jnp.float32).reshape(B, N, 1)                    # 1=keep
    keep1 = jnp.pad(mask1.astype(jnp.float32),
                    ((0, 0), (0, Mp - M))).reshape(B, 1, Mp)           # 1=keep, 0=masked/pad
    fill1 = jnp.where(jnp.arange(Mp) < M, -INF, NEG_PAD)               # per-column fill
    fill1 = fill1.astype(jnp.float32).reshape(1, 1, Mp)

    out = pl.pallas_call(
        assign_kernel,
        out_shape=jax.ShapeDtypeStruct((B, N, Mp), out_dtype),
        grid_spec=pltpu.PrefetchScalarGridSpec(
            num_scalar_prefetch=0,
            grid=(B, gn),
            in_specs=[
                pl.BlockSpec((1, D, tn), lambda b, n: (b, 0, n)),   # sparse (NCW)
                pl.BlockSpec((1, D, Mp), lambda b, n: (b, 0, 0)),   # dense  (NCW, padded)
                pl.BlockSpec((1, tn, 1), lambda b, n: (b, n, 0)),   # mask0
                pl.BlockSpec((1, 1, Mp), lambda b, n: (b, 0, 0)),   # mask1 keep (+pad)
                pl.BlockSpec((1, 1, Mp), lambda b, n: (0, 0, 0)),   # per-column fill row
                pl.BlockSpec((D, D), lambda b, n: (0, 0)),          # W * scale/temp
                pl.BlockSpec((D, D), lambda b, n: (0, 0)),          # W
                pl.BlockSpec((D, 1), lambda b, n: (0, 0)),          # bias * scale/temp
                pl.BlockSpec((D, 1), lambda b, n: (0, 0)),          # bias
            ],
            out_specs=pl.BlockSpec((1, tn, Mp), lambda b, n: (b, n, 0)),
            scratch_shapes=[pltpu.VMEM((D, Mp), cdt)],              # cached dense proj
        ),
        compiler_params=pltpu.CompilerParams(
            dimension_semantics=("parallel", "arbitrary"),
            vmem_limit_bytes=vlim),
    )(sp, de, m0, keep1, fill1, w_sp, w_de, b_sp, b_de)

    if unpad and Mp != M:
        # NOTE: this slice is a full HBM pass over the output; pass unpad=False
        # to receive the padded (B, N, Mp) tensor and fuse the slice downstream.
        out = out[:, :, :M]
    return out


def reference_forward(sparse, dense, mask0, mask1, weight, bias, *, temp):
    D = sparse.shape[1]
    scale = D ** (-0.5)
    proj = lambda x: jnp.einsum('oi,bin->bon', weight, x) + bias[None, :, None]
    sp, de = proj(sparse), proj(dense)
    raw = scale * jnp.einsum('bdn,bdm->bnm', sp, de) / temp
    raw = jnp.where(mask0[:, :, None], raw, -INF)
    raw = jnp.where(mask1[:, None, :], raw, -INF)
    return jax.nn.softmax(raw, axis=2)


if __name__ == "__main__":
    key = jax.random.PRNGKey(0)
    k_sp, k_de, k_w, k_b, k_m0, k_m1 = jax.random.split(key, 6)

    B, D, N, M = 4, 32, 16, 16
    learnable_temp = True
    temp = 0.1 if learnable_temp else 1.0

    sparse = jax.random.normal(k_sp, (B, D, N), dtype=jnp.float32)
    dense = jax.random.normal(k_de, (B, D, M), dtype=jnp.float32)

    # Deterministic Conv1d(dim, dim, kernel_size=1) params (weight squeezed to (D, D)).
    weight = 0.1 * jax.random.normal(k_w, (D, D), dtype=jnp.float32)
    bias = 0.1 * jax.random.normal(k_b, (D,), dtype=jnp.float32)

    mask0 = jax.random.bernoulli(k_m0, 0.8, (B, N))
    mask1 = jax.random.bernoulli(k_m1, 0.8, (B, M))
    # Edge cases: a fully-masked row (via mask0) and a fully-masked batch (via mask1);
    # both must produce uniform 1/M rows because INF is the finite 10000.0 sentinel.
    mask0 = mask0.at[0, 3].set(False)
    mask1 = mask1.at[1, :].set(False)

    # f32 path
    out = assign_forward(sparse, dense, mask0, mask1, weight, bias, temp=temp)
    out = jax.block_until_ready(out)
    ref = reference_forward(sparse, dense, mask0, mask1, weight, bias, temp=temp)
    assert out.shape == (B, N, M)
    # atol leaves headroom for the approx (EUP) reciprocal in the softmax.
    assert jnp.allclose(out, ref, atol=5e-3), "f32 mismatch vs reference"
    assert jnp.allclose(out[1], 1.0 / M, atol=5e-3), "fully-masked batch not uniform"

    # bf16 streaming path (bf16 in -> bf16 out; halves HBM traffic both ways).
    out_bf16 = assign_forward(sparse.astype(jnp.bfloat16), dense.astype(jnp.bfloat16),
                              mask0, mask1, weight, bias, temp=temp)
    out_bf16 = jax.block_until_ready(out_bf16)
    assert out_bf16.dtype == jnp.bfloat16
    ref_bf16 = reference_forward(
        sparse.astype(jnp.bfloat16).astype(jnp.float32),
        dense.astype(jnp.bfloat16).astype(jnp.float32),
        mask0, mask1,
        weight.astype(jnp.bfloat16).astype(jnp.float32), bias, temp=temp)
    assert jnp.allclose(out_bf16.astype(jnp.float32), ref_bf16, atol=5e-2), \
        "bf16 mismatch vs reference"

    print("KERNEL_OK")
</pallas_src>

<mosaic_0001>
module attributes {stable_mosaic.version = 11 : i64} {
  func.func @assign_kernel(%arg0: i32, %arg1: i32, %arg2: memref<1x32x16xf32, #tpu.memory_space<vmem>>, %arg3: memref<1x32x128xf32, #tpu.memory_space<vmem>>, %arg4: memref<1x16x1xf32, #tpu.memory_space<vmem>>, %arg5: memref<1x1x128xf32, #tpu.memory_space<vmem>>, %arg6: memref<1x1x128xf32, #tpu.memory_space<vmem>>, %arg7: memref<32x32xf32, #tpu.memory_space<vmem>>, %arg8: memref<32x32xf32, #tpu.memory_space<vmem>>, %arg9: memref<32x1xf32, #tpu.memory_space<vmem>>, %arg10: memref<32x1xf32, #tpu.memory_space<vmem>>, %arg11: memref<1x16x128xf32, #tpu.memory_space<vmem>>, %arg12: memref<32x128xf32, #tpu.memory_space<vmem>>) attributes {dimension_semantics = [#tpu.dimension_semantics<parallel>, #tpu.dimension_semantics<arbitrary>], iteration_bounds = array<i64: 4, 1>, scalar_prefetch = 0 : i64, scratch_operands = 1 : i64, tpu.core_type = #tpu.core_type<tc>, window_params = [{transform_indices = @transform_0, window_bounds = array<i64: 1, 32, 16>}, {transform_indices = @transform_1, window_bounds = array<i64: 1, 32, 128>}, {transform_indices = @transform_2, window_bounds = array<i64: 1, 16, 1>}, {transform_indices = @transform_3, window_bounds = array<i64: 1, 1, 128>}, {pipeline_mode = #tpu.pipeline_mode<synchronous>, transform_indices = @transform_4, window_bounds = array<i64: 1, 1, 128>}, {pipeline_mode = #tpu.pipeline_mode<synchronous>, transform_indices = @transform_5, window_bounds = array<i64: 32, 32>}, {pipeline_mode = #tpu.pipeline_mode<synchronous>, transform_indices = @transform_6, window_bounds = array<i64: 32, 32>}, {pipeline_mode = #tpu.pipeline_mode<synchronous>, transform_indices = @transform_7, window_bounds = array<i64: 32, 1>}, {pipeline_mode = #tpu.pipeline_mode<synchronous>, transform_indices = @transform_8, window_bounds = array<i64: 32, 1>}, {transform_indices = @transform_9, window_bounds = array<i64: 1, 16, 128>}]} {
    %c0_i32 = arith.constant 0 : i32
    %0 = arith.cmpi eq, %arg1, %c0_i32 : i32
    %1 = arith.extui %0 : i1 to i32
    %c0_i32_0 = arith.constant 0 : i32
    %2 = arith.cmpi ne, %1, %c0_i32_0 : i32
    scf.if %2 {
      %c0_26 = arith.constant 0 : index
      %c0_27 = arith.constant 0 : index
      %41 = vector.load %arg8[%c0_26, %c0_27] : memref<32x32xf32, #tpu.memory_space<vmem>>, vector<32x32xf32>
      %c0_28 = arith.constant 0 : index
      %c0_29 = arith.constant 0 : index
      %c0_30 = arith.constant 0 : index
      %42 = vector.load %arg3[%c0_28, %c0_29, %c0_30] : memref<1x32x128xf32, #tpu.memory_space<vmem>>, vector<1x32x128xf32>
      %43 = vector.shape_cast %42 : vector<1x32x128xf32> to vector<32x128xf32>
      %cst_31 = arith.constant dense<0.000000e+00> : vector<32x128xf32>
      %44 = tpu.matmul %41, %43, %cst_31 {dimension_numbers = #tpu.dot_dimension_numbers<[1], [0], [0], [1], [0, 0, 1, 1], [], []>} : vector<32x32xf32>, vector<32x128xf32>, vector<32x128xf32> -> vector<32x128xf32>
      %c0_32 = arith.constant 0 : index
      %c0_33 = arith.constant 0 : index
      %45 = vector.load %arg10[%c0_32, %c0_33] : memref<32x1xf32, #tpu.memory_space<vmem>>, vector<32x1xf32>
      %46 = vector.broadcast %45 : vector<32x1xf32> to vector<32x128xf32>
      %47 = arith.addf %44, %46 : vector<32x128xf32>
      %c0_34 = arith.constant 0 : index
      %c0_35 = arith.constant 0 : index
      %48 = vector.load %arg12[%c0_34, %c0_35] : memref<32x128xf32, #tpu.memory_space<vmem>>, vector<32x128xf32>
      tpu.vector_store %arg12[%c0_34, %c0_35], %47 {strides = array<i32>} : memref<32x128xf32, #tpu.memory_space<vmem>>, vector<32x128xf32>,
    } else {
    }
    %c0 = arith.constant 0 : index
    %c0_1 = arith.constant 0 : index
    %3 = vector.load %arg7[%c0, %c0_1] : memref<32x32xf32, #tpu.memory_space<vmem>>, vector<32x32xf32>
    %c0_2 = arith.constant 0 : index
    %c0_3 = arith.constant 0 : index
    %c0_4 = arith.constant 0 : index
    %4 = vector.load %arg2[%c0_2, %c0_3, %c0_4] : memref<1x32x16xf32, #tpu.memory_space<vmem>>, vector<1x32x16xf32>
    %5 = vector.shape_cast %4 : vector<1x32x16xf32> to vector<32x16xf32>
    %cst = arith.constant dense<0.000000e+00> : vector<32x16xf32>
    %6 = tpu.matmul %3, %5, %cst {dimension_numbers = #tpu.dot_dimension_numbers<[1], [0], [0], [1], [0, 0, 1, 1], [], []>} : vector<32x32xf32>, vector<32x16xf32>, vector<32x16xf32> -> vector<32x16xf32>
    %c0_5 = arith.constant 0 : index
    %c0_6 = arith.constant 0 : index
    %7 = vector.load %arg9[%c0_5, %c0_6] : memref<32x1xf32, #tpu.memory_space<vmem>>, vector<32x1xf32>
    %8 = vector.broadcast %7 : vector<32x1xf32> to vector<32x16xf32>
    %9 = arith.addf %6, %8 : vector<32x16xf32>
    %c0_7 = arith.constant 0 : index
    %c0_8 = arith.constant 0 : index
    %10 = vector.load %arg12[%c0_7, %c0_8] : memref<32x128xf32, #tpu.memory_space<vmem>>, vector<32x128xf32>
    %cst_9 = arith.constant dense<0.000000e+00> : vector<16x128xf32>
    %11 = tpu.matmul %9, %10, %cst_9 {dimension_numbers = #tpu.dot_dimension_numbers<[0], [0], [1], [1], [0, 1, 1, 1], [], []>} : vector<32x16xf32>, vector<32x128xf32>, vector<16x128xf32> -> vector<16x128xf32>
    %c0_10 = arith.constant 0 : index
    %c0_11 = arith.constant 0 : index
    %c0_12 = arith.constant 0 : index
    %12 = vector.load %arg4[%c0_10, %c0_11, %c0_12] : memref<1x16x1xf32, #tpu.memory_space<vmem>>, vector<1x16x1xf32>
    %13 = vector.shape_cast %12 : vector<1x16x1xf32> to vector<16x1xf32>
    %cst_13 = arith.constant 5.000000e-01 : f32
    %14 = vector.broadcast %cst_13 : f32 to vector<16x1xf32>
    %15 = arith.cmpf ogt, %13, %14 : vector<16x1xf32>
    %c0_14 = arith.constant 0 : index
    %c0_15 = arith.constant 0 : index
    %c0_16 = arith.constant 0 : index
    %16 = vector.load %arg5[%c0_14, %c0_15, %c0_16] : memref<1x1x128xf32, #tpu.memory_space<vmem>>, vector<1x1x128xf32>
    %17 = vector.shape_cast %16 : vector<1x1x128xf32> to vector<1x128xf32>
    %cst_17 = arith.constant 5.000000e-01 : f32
    %18 = vector.broadcast %cst_17 : f32 to vector<1x128xf32>
    %19 = arith.cmpf ogt, %17, %18 : vector<1x128xf32>
    %20 = vector.broadcast %15 : vector<16x1xi1> to vector<16x128xi1>
    %21 = vector.broadcast %19 : vector<1x128xi1> to vector<16x128xi1>
    %22 = arith.andi %20, %21 : vector<16x128xi1>
    %c0_18 = arith.constant 0 : index
    %c0_19 = arith.constant 0 : index
    %c0_20 = arith.constant 0 : index
    %23 = vector.load %arg6[%c0_18, %c0_19, %c0_20] : memref<1x1x128xf32, #tpu.memory_space<vmem>>, vector<1x1x128xf32>
    %24 = vector.shape_cast %23 : vector<1x1x128xf32> to vector<1x128xf32>
    %25 = vector.shape_cast %24 : vector<1x128xf32> to vector<1x128xf32>
    %26 = vector.broadcast %25 : vector<1x128xf32> to vector<16x128xf32>
    %27 = arith.select %22, %11, %26 : vector<16x128xi1>, vector<16x128xf32>
    %cst_21 = arith.constant dense<0xFF800000> : vector<16xf32>
    %28 = vector.multi_reduction <maximumf>, %27, %cst_21 [1] : vector<16x128xf32> to vector<16xf32>
    %29 = vector.shape_cast %28 : vector<16xf32> to vector<16x1xf32>
    %30 = vector.broadcast %29 : vector<16x1xf32> to vector<16x128xf32>
    %31 = arith.subf %27, %30 : vector<16x128xf32>
    %32 = math.exp %31 : vector<16x128xf32>
    %cst_22 = arith.constant dense<0.000000e+00> : vector<16xf32>
    %33 = vector.multi_reduction <add>, %32, %cst_22 [1] : vector<16x128xf32> to vector<16xf32>
    %34 = vector.shape_cast %33 : vector<16xf32> to vector<16x1xf32>
    %35 = tpu.reciprocal %34 {approx = true} : vector<16x1xf32> -> vector<16x1xf32>
    %36 = vector.broadcast %35 : vector<16x1xf32> to vector<16x128xf32>
    %37 = arith.mulf %32, %36 : vector<16x128xf32>
    %c0_23 = arith.constant 0 : index
    %c0_24 = arith.constant 0 : index
    %c0_25 = arith.constant 0 : index
    %38 = vector.load %arg11[%c0_23, %c0_24, %c0_25] : memref<1x16x128xf32, #tpu.memory_space<vmem>>, vector<1x16x128xf32>
    %39 = vector.shape_cast %38 : vector<1x16x128xf32> to vector<16x128xf32>
    %40 = vector.shape_cast %37 : vector<16x128xf32> to vector<1x16x128xf32>
    tpu.vector_store %arg11[%c0_23, %c0_24, %c0_25], %40 {strides = array<i32>} : memref<1x16x128xf32, #tpu.memory_space<vmem>>, vector<1x16x128xf32>,
    return
  }
  func.func @transform_0(%arg0: i32, %arg1: i32) -> (i32, i32, i32) {
    %c0_i32 = arith.constant 0 : i32
    %c0_i32_0 = arith.constant 0 : i32
    return %arg0, %c0_i32, %arg1 : i32, i32, i32
  }
  func.func @transform_1(%arg0: i32, %arg1: i32) -> (i32, i32, i32) {
    %c0_i32 = arith.constant 0 : i32
    %c0_i32_0 = arith.constant 0 : i32
    %c0_i32_1 = arith.constant 0 : i32
    return %arg0, %c0_i32, %c0_i32_0 : i32, i32, i32
  }
  func.func @transform_2(%arg0: i32, %arg1: i32) -> (i32, i32, i32) {
    %c0_i32 = arith.constant 0 : i32
    %c0_i32_0 = arith.constant 0 : i32
    return %arg0, %arg1, %c0_i32 : i32, i32, i32
  }
  func.func @transform_3(%arg0: i32, %arg1: i32) -> (i32, i32, i32) {
    %c0_i32 = arith.constant 0 : i32
    %c0_i32_0 = arith.constant 0 : i32
    %c0_i32_1 = arith.constant 0 : i32
    return %arg0, %c0_i32, %c0_i32_0 : i32, i32, i32
  }
  func.func @transform_4(%arg0: i32, %arg1: i32) -> (i32, i32, i32) {
    %c0_i32 = arith.constant 0 : i32
    %c0_i32_0 = arith.constant 0 : i32
    %c0_i32_1 = arith.constant 0 : i32
    %c0_i32_2 = arith.constant 0 : i32
    return %c0_i32, %c0_i32_0, %c0_i32_1 : i32, i32, i32
  }
  func.func @transform_5(%arg0: i32, %arg1: i32) -> (i32, i32) {
    %c0_i32 = arith.constant 0 : i32
    %c0_i32_0 = arith.constant 0 : i32
    %c0_i32_1 = arith.constant 0 : i32
    return %c0_i32, %c0_i32_0 : i32, i32
  }
  func.func @transform_6(%arg0: i32, %arg1: i32) -> (i32, i32) {
    %c0_i32 = arith.constant 0 : i32
    %c0_i32_0 = arith.constant 0 : i32
    %c0_i32_1 = arith.constant 0 : i32
    return %c0_i32, %c0_i32_0 : i32, i32
  }
  func.func @transform_7(%arg0: i32, %arg1: i32) -> (i32, i32) {
    %c0_i32 = arith.constant 0 : i32
    %c0_i32_0 = arith.constant 0 : i32
    %c0_i32_1 = arith.constant 0 : i32
    return %c0_i32, %c0_i32_0 : i32, i32
  }
  func.func @transform_8(%arg0: i32, %arg1: i32) -> (i32, i32) {
    %c0_i32 = arith.constant 0 : i32
    %c0_i32_0 = arith.constant 0 : i32
    %c0_i32_1 = arith.constant 0 : i32
    return %c0_i32, %c0_i32_0 : i32, i32
  }
  func.func @transform_9(%arg0: i32, %arg1: i32) -> (i32, i32, i32) {
    %c0_i32 = arith.constant 0 : i32
    %c0_i32_0 = arith.constant 0 : i32
    return %arg0, %arg1, %c0_i32 : i32, i32, i32
  }
}

</mosaic_0001>

<bundles_post_ra>
// kernel: tpu_custom_call.1
= control target key start
LH: loop header
LB: loop body
LE: loop exit
PB: predicated region body
PF: predicated region fallthrough
CT: control target
= control target key end

     0   :  { %14 = vsyncpa [#allocation4], 0  ;;  %s1514_s0 = inlined_call_operand.vmem [shape: f32[4,32,16], index: 0, kind: input, shape index: {}]   ;;  %s1515_s1 = inlined_call_operand.vmem [shape: f32[4,32,128], index: 1, kind: input, shape index: {}]   ;;  %s1516_s2 = inlined_call_operand.vmem [shape: f32[4,16,1], index: 2, kind: input, shape index: {}]   ;;  %s1517_s3 = inlined_call_operand.vmem [shape: f32[4,1,128], index: 3, kind: input, shape index: {}]   ;;  %s1518_s4 = inlined_call_operand.vmem [shape: f32[1,1,128], index: 4, kind: input, shape index: {}]   ;;  %s1519_s5 = inlined_call_operand.vmem [shape: f32[32,32], index: 5, kind: input, shape index: {}]   ;;  %s1520_s6 = inlined_call_operand.vmem [shape: f32[32,32], index: 6, kind: input, shape index: {}]   ;;  %s1521_s7 = inlined_call_operand.vmem [shape: f32[32,1], index: 7, kind: input, shape index: {}]   ;;  %s1522_s8 = inlined_call_operand.vmem [shape: f32[32,1], index: 8, kind: input, shape index: {}]   ;;  %s1523_s9 = inlined_call_operand.hbm [shape: f32[4,16,128], index: 9, kind: output, shape index: {}]  }
   0x1   :  { %16 = vsyncpa [#allocation4 + $0x1], 0  ;;  %s1319_s30 = smov 0   ;;  %s1321_s10 = smov 0  }
   0x2   :  { %s1323_s11 = smov 0   ;;  %s1325_s12 = smov 0  }
   0x3   :  { %s1327_s13 = smov 0   ;;  %s1329_s14 = smov 0  }
   0x4 LB: > { %1527 = sst [smem:[#allocation6_spill]] %s1251_s11  ;;  %s999_s15 = sadd.s32 4294967295, %s1263_s14   ;;  %s1263_s14 = sphi %s1329_s14, %s22_s14   ;;  %s1259_s13 = sphi %s1327_s13, %s1536_s13   ;;  %s1255_s12 = sphi %s1325_s12, %s1539_s12   ;;  %s1251_s11 = sphi %s1323_s11, %s1534_s11   ;;  %s1247_s10 = sphi %s1321_s10, %s1538_s10   ;;  %s1243_s30 = sphi %s1319_s30, %s1537_s30  }
   0x5   : > { %1528 = sst [smem:[#allocation7_spill]] %s1259_s13  ;;  %s1000_s16 = sadd.s32 4294967294, %s1263_s14  }
   0x6   : > { %s34_s17 = sadd.s32 1, %s1259_s13  ;;  %s256_s18 = sadd.s32 1, %s1251_s11 }
   0x7   : > { %p36_p0 = scmp.ge.s32.totalorder %s34_s17, 4  ;;  %p266_p1 = scmp.ne.s32.totalorder %s1251_s11, %s1247_s10 }
   0x8   : > { %p267_p2 = scmp.eq.s32.totalorder %s999_s15, 3  ;;  %p272_p3 = scmp.ne.s32.totalorder %s1247_s10, %s1243_s30 }
   0x9   : > { %s1541_s17 = smov (%p36_p0, %s34_s17), 0  ;;  %p273_p5 = scmp.eq.s32.totalorder %s1000_s16, 3 }
   0xa   : > { %1529 = sst [smem:[#allocation8_spill]] %s1541_s17  ;;  %p1359_p4 = por %p267_p2, %p266_p1 }
   0xb   : > { %s251_s20 = ssub.s32 %s1259_s13, %s1541_s17  ;;  %p1003_p6 = scmp.ge.s32.totalorder %s1263_s14, 1 }
   0xc   : > { %p254_p7 = scmp.eq.s32.totalorder %s251_s20, 0  ;;  %p1366_p8 = por %p273_p5, %p272_p3 }
   0xd   : > { %p344_p9 = scmp.lt.s32.totalorder %s1263_s14, 5 }
   0xe   : > { %s1372_s22 = scalar_select %p254_p7, %s1251_s11, %s256_s18  }
   0xf   : > { %p345_p10 = pnand %p1003_p6, %p344_p9 }
  0x10   : > { %1532 = sst [smem:[#allocation9_spill]] %s1372_s22  ;;  %p400_p11 = scmp.lt.s32.totalorder (!%p345_p10), %s1255_s12, 3  ;;  %v431_v0 = vld [vmem:[%s1520_s6] sm:$0xff] (!%p345_p10)  ;;  %vm463_vm0 = vcmask (!%p345_p10), 261120   ;;  %v1265_v2 = vmov (!%p345_p10), 0   ;;  %v575_v3 = vld [vmem:[%s1521_s7 + $0x10] sm:$0xff] (!%p345_p10)  ;;  %v829_v61 = vlaneseq (!%p345_p10) }
  0x11   : > { %348 = sbr.rel (%p345_p10) target bundleno = 933 (0x3a5), region = 56  ;;  %v565_v1 = vld [vmem:[%s1519_s5] sm:$0xff] (!%p345_p10)  ;;  %1061 = vmatprep.mubr.msk.f32.mxu0 (!%p345_p10), %vm463_vm0, %v431_v0  ;;  %1176 = vset.pattern.permute.xlu1 (!%p345_p10), %v1265_v2  ;;  %v576_v5 = vld [vmem:[%s1521_s7 + $0x18] sm:$0xff] (!%p345_p10)  ;;  %v574_v6 = vld [vmem:[%s1521_s7 + $0x8] sm:$0xff] (!%p345_p10)  ;;  %s1030_s13 = sshll.u32 (!%p345_p10), %s1255_s12, 8 }
  0x12   : > { %1075 = vmatprep.mubr.msk.f32.mxu1 (!%p345_p10), %vm463_vm0, %v565_v1  ;;  %1175 = vset.pattern.permute.xlu0 (!%p345_p10), %v1265_v2  ;;  %v573_v4 = vld [vmem:[%s1521_s7] sm:$0xff] (!%p345_p10)  ;;  %v440_v19 = vld [vmem:[%s1522_s8 + $0x8] sm:$0xff] (!%p345_p10)  ;;  %v442_v22 = vld [vmem:[%s1522_s8 + $0x18] sm:$0xff] (!%p345_p10)  ;;  %v830_v63 = vshrl.u32 (!%p345_p10), %v829_v61, 7  ;;  %s1464_s20 = scalar_lea.hbm (!%p345_p10), %s1523_s9, %s1030_s13 }
  0x13   : > { %589 = vperm.xlu1 (!%p345_p10), %1176, %v575_v3   ;;  %579 = vperm.xlu0 (!%p345_p10), %1175, %v573_v4   ;;  %v439_v20 = vld [vmem:[%s1522_s8] sm:$0xff] (!%p345_p10)  ;;  %v432_v23 = vld [vmem:[%s1520_s6 + $0x8] sm:$0xff] (!%p345_p10)  ;;  %v441_v24 = vld [vmem:[%s1522_s8 + $0x10] sm:$0xff] (!%p345_p10) }
  0x14   : > { %v566_v25 = vld [vmem:[%s1519_s5 + $0x8] sm:$0xff] (!%p345_p10)  ;;  %v433_v26 = vld [vmem:[%s1520_s6 + $0x10] sm:$0xff] (!%p345_p10)  ;;  %v434_v30 = vld [vmem:[%s1520_s6 + $0x18] sm:$0xff] (!%p345_p10)  ;;  %v831_v1 = vsub.s32 (!%p345_p10), 0, %v830_v63 }
  0x15   : > { %v567_v28 = vld [vmem:[%s1519_s5 + $0x10] sm:$0xff] (!%p345_p10)  ;;  %v568_v31 = vld [vmem:[%s1519_s5 + $0x18] sm:$0xff] (!%p345_p10) }
  0x17   : > { %594 = vperm.xlu1 (!%p345_p10), %1176, %v576_v5   ;;  %584 = vperm.xlu0 (!%p345_p10), %1175, %v574_v6   ;;  %v1021_v6 = vld [vmem:[%s1518_s4] ss:$0 sm:$0xff] (!%p345_p10) }
  0x18   : > { %s1384_s27 = scalar_select %p400_p11, %s1255_s12, 3 }
  0x19   : > { %s1266_s12 = smov [#allocation3]  }
  0x1a   : > { %s1027_s18 = sshll.u32 %s1384_s27, 5  ;;  %s1029_s24 = sshll.u32 %s1384_s27, 4 }
  0x1b   : > { %s412_s17 = scalar_lea.vmem %s1515_s1, %s1027_s18  ;;  %s407_s28 = scalar_lea.vmem %s1514_s0, %s1027_s18  ;;  %450 = vperm.xlu1 %1176, %v440_v19   ;;  %445 = vperm.xlu0 %1175, %v439_v20  }
  0x1c   : > { %v435_v7 = vld [vmem:[%s412_s17] sm:$0xff]  ;;  %v436_v8 = vld [vmem:[%s412_s17 + $0x8] sm:$0xff]  ;;  %v437_v12 = vld [vmem:[%s412_s17 + $0x10] sm:$0xff]  ;;  %s421_s22 = scalar_lea.vmem %s1516_s2, %s1029_s24  ;;  %s425_s26 = scalar_lea.vmem %s1517_s3, %s1384_s27 }
  0x1d   : > { %v569_v9 = vld [vmem:[%s407_s28] sm:$0xff]  ;;  %v1092_v10 = vpack.c.bf16 %v436_v8, %v435_v7  ;;  %v570_v11 = vld [vmem:[%s407_s28 + $0x8] sm:$0xff]  ;;  %v438_v13 = vld [vmem:[%s412_s17 + $0x18] sm:$0xff]  ;;  %s397_s27 = sand.u32 1, %s1247_s10   ;;  %s1189_s24 = sshll.u32 %s1266_s12, 4  ;;  %s1190_s24 = int_to_ptr.vmem [resolvable:$false] %s1189_s24 }
  0x1e   : > { %v1100_v14 = vpack.c.bf16 %v570_v11, %v569_v9  ;;  %v1096_v15 = vpack.c.bf16 %v438_v13, %v437_v12  ;;  %v571_v16 = vld [vmem:[%s407_s28 + $0x10] sm:$0xff]  ;;  %v572_v17 = vld [vmem:[%s407_s28 + $0x18] sm:$0xff]  ;;  %v812_v21 = vld [vmem:[%s421_s22] sm:$0xff]  ;;  %s1004_s15 = sshll.u32 %s397_s27, 4  ;;  %s1191_s25 = scalar_lea.vmem %s1190_s24, 512 }
  0x1f   : > { %1093 = vmatprep.subr.bf16.mxu0 %v1092_v10  ;;  %v1104_v18 = vpack.c.bf16 %v572_v17, %v571_v16  ;;  %vm814_vm1 = vcmp.gt.f32.partialorder %v812_v21, 0.5  ;;  %v813_v27 = vld [vmem:[%s421_s22 + $0x8] sm:$0xff]  ;;  %460 = vperm.xlu1 %1176, %v442_v22   ;;  %v816_v62 = vld [vmem:[%s425_s26] sm:$0x1]  ;;  %s399_s11 = scalar_lea.vmem [#allocation3], %s1004_s15  ;;  %s1468_s22 = scalar_lea.sflag [#allocation4], %s397_s27 }
  0x20   : > { %1101 = vmatprep.subr.bf16.mxu1 %v1100_v14  ;;  %1095 = vmatpush3.bf16.msra.mxu0 %v1092_v10  ;;  %v818_v29 = vsel %vm814_vm1, 1, %v1265_v2  ;;  %vm815_vm2 = vcmp.gt.f32.partialorder %v813_v27, 0.5  ;;  %vm817_vm3 = vcmp.gt.f32.partialorder %v816_v62, 0.5  ;;  %s881_s16 = sshll.u32 %s399_s11, 4  ;;  %s1466_s16 = int_to_ptr.vmem [resolvable:$true] %s881_s16 }
  0x21   : > { %1103 = vmatpush3.bf16.msra.mxu1 %v1100_v14  ;;  %1097 = vmatprep.subr.bf16.mxu0 %v1096_v15  ;;  %v819_v32 = vsel %vm815_vm2, 1, %v1265_v2  ;;  %v828_v3 = vsel %vm817_vm3, 1, %v1265_v2  ;;  %s1185_s23 = scalar_lea.vmem %s1466_s16, 256  ;;  %p1192_p1 = scmp.lt.s32.totalorder %s1466_s16, %s1190_s24 }
  0x22   : > { %1105 = vmatprep.subr.bf16.mxu1 %v1104_v18  ;;  %455 = vperm.xlu0 %1175, %v441_v24   ;;  %v832_v4 = vrot.slane %v828_v3, %v831_v1  ;;  %p1186_p12 = scmp.ne.s32.totalorder %s1466_s16, %s1185_s23  ;;  %p1193_p2 = scmp.lt.s32.totalorder %s1191_s25, %s1185_s23 }
  0x23   : > { %821 = vperm.xlu1 %1176, %v818_v29  }
  0x24   : > { %1099 = vmatpush3.bf16.msra.mxu0 %v1096_v15  ;;  %vm833_vm4 = vcmp.eq.s32.totalorder %v832_v4, 1  ;;  %p1187_p13 = pnand %p1186_p12, %p1359_p4  ;;  %p1194_p3 = por %p1193_p2, %p1192_p1 }
  0x25   : > { %1107 = vmatpush3.bf16.msra.mxu1 %v1104_v18 }
  0x26   : > { %p1188_p0 = pneg %p1187_p13 }
  0x27   : > { %1062 = vmatmul.mubr.msk.f32.vlgmr.msra.gmra.mrb[0].mxu0 %vm463_vm0, %v432_v23  ;;  %824 = vperm.xlu1 %1176, %v819_v32  }
  0x28   : > { %1076 = vmatmul.mubr.msk.f32.vlgmr.msra.gmra.mrb[0].mxu1 %vm463_vm0, %v566_v25  ;;  %1064 = vmatprep.mubr.msk.f32.mxu0 %vm463_vm0, %v433_v26  ;;  %p1195_p5 = pnand %p1194_p3, %p1188_p0 }
  0x29   : > { %1078 = vmatprep.mubr.msk.f32.mxu1 %vm463_vm0, %v567_v28 }
  0x2b   : > { %1065 = vmatmul.mubr.msk.f32.gmra.mrb[2].mxu0 %vm463_vm0, %v434_v30 }
  0x2c   : > { %1079 = vmatmul.mubr.msk.f32.gmra.mrb[2].mxu1 %vm463_vm0, %v568_v31 }
  0x92   : > { %v590_v33 = vpop.permute.xlu1 %589  ;;  %v580_v34 = vpop.permute.xlu0 %579 }
  0x96   : > { %v595_v35 = vpop.permute.xlu1 %594  ;;  %v585_v36 = vpop.permute.xlu0 %584 }
  0x9a   : > { %v451_v37 = vpop.permute.xlu1 %450  ;;  %v446_v38 = vpop.permute.xlu0 %445 }
  0x9e   : > { %v461_v45 = vpop.permute.xlu1 %460 }
  0xa1   : > { %v456_v47 = vpop.permute.xlu0 %455 }
  0xa2   : > { %v822_v0 = vpop.permute.xlu1 %821 }
  0xa3   : > { %vm826_vm6 = vcmp.eq.s32.totalorder %v822_v0, 1 }
  0xa4   : > { %vm834_vm8 = vmand %vm826_vm6, %vm833_vm4 }
  0xa6   : > { %v825_v5 = vpop.permute.xlu1 %824 }
  0xa7   : > { %vm827_vm5 = vcmp.eq.s32.totalorder %v825_v5, 1 }
  0xa8   : > { %vm835_vm7 = vmand %vm827_vm5, %vm833_vm4 }
  0xfa   : > { %v1063_v39 = vpop.f32.mrb[0].mxu0 }
  0xfb   : > { %v548_v40 = vadd.f32 %v1063_v39, %v451_v37  ;;  %v1077_v41 = vpop.f32.mrb[0].mxu1  ;;  %v542_v42 = vpop.f32.mrb[1].mxu0 }
  0xfc   : > { %v543_v43 = vadd.f32 %v542_v42, %v446_v38  ;;  %v676_v44 = vpop.f32.mrb[1].mxu1  ;;  %v682_v55 = vadd.f32 %v1077_v41, %v585_v36 }
  0xfd   : > { %v677_v46 = vadd.f32 %v676_v44, %v580_v34 }
  0xfe   : > { %v1108_v48 = vpack.c.bf16 %v548_v40, %v543_v43  ;;  %v1066_v49 = vpop.f32.mrb[2].mxu0 }
  0xff   : > { %v558_v50 = vadd.f32 %v1066_v49, %v461_v45  ;;  %699 = vxpose.xlu0.b32.start [1/4] (short) (narrow) %v677_v46, 16  ;;  %v552_v51 = vpop.f32.mrb[3].mxu0  ;;  %v1080_v52 = vpop.f32.mrb[2].mxu1 }
 0x100   : > { %v553_v53 = vadd.f32 %v552_v51, %v456_v47  ;;  %1109 = vmatprep.subr.bf16.mxu0 %v1108_v48  ;;  %v686_v54 = vpop.f32.mrb[3].mxu1  ;;  %v692_v58 = vadd.f32 %v1080_v52, %v595_v35 }
 0x101   : > { %1111 = vmatpush3.bf16.msra.mxu0 %v1108_v48  ;;  %v687_v57 = vadd.f32 %v686_v54, %v590_v33 }
 0x102   : > { %v1112_v56 = vpack.c.bf16 %v558_v50, %v553_v53 }
 0x103   : > { %700 = vxpose.xlu0.b32.cont [2/4] (short) (narrow) %v682_v55, 16 }
 0x104   : > { %1113 = vmatprep.subr.bf16.mxu0 %v1112_v56 }
 0x105   : > { %1115 = vmatpush3.bf16.msra.mxu0 %v1112_v56 }
 0x107   : > { %701 = vxpose.xlu0.b32.cont [3/4] (short) (narrow) %v687_v57, 16 }
 0x10b   : > { %702 = vxpose.xlu0.b32.end [4/4] (short) (narrow) %v692_v58, 16 }
 0x17f   : > { %v715_v59 = vpop.trf.xlu0 }
 0x180   : > { %1089 = vmatprep.mubr.msk.f32.mxu0 %vm463_vm0, %v715_v59 }
 0x183   : > { %v716_v60 = vpop.trf.xlu0 }
 0x184   : > { %1090 = vmatmul.mubr.msk.f32.vlgmr.msra.gmra.mrb[4].mxu0 %vm463_vm0, %v716_v60 }
 0x257   : > { %v1091_v7 = vpop.f32.mrb[4].mxu0 }
 0x258   : > { %v803_v8 = vpop.f32.mrb[5].mxu0  ;;  %v844_v9 = vsel %vm835_vm7, %v1091_v7, %v1021_v6 }
 0x259   : > { %847 = vmax.xlane.f32.xlu0 %v844_v9  ;;  %v843_v10 = vsel %vm834_vm8, %v803_v8, %v1021_v6 }
 0x25a   : > { %845 = vmax.xlane.f32.xlu1 %v843_v10 }
 0x2e6   : > { %v848_v11 = vpop.xlane.xlu0 %847 }
 0x2e7   : > { %v846_v2 = vpop.xlane.xlu1 %845  ;;  %v850_v12 = vsub.f32 %v844_v9, %v848_v11 }
 0x2e8   : > { %v849_v13 = vsub.f32 %v843_v10, %v846_v2 }
 0x2e9   : > { %v853_v15 = vmul.f32 1.442695, %v850_v12 }
 0x2ea   : > { %v851_v14 = vmul.f32 1.442695, %v849_v13 }
 0x2ec   : > { %1177 = vpow2.f32 %v851_v14 }
 0x2ed   : > { %1179 = vpow2.f32 %v853_v15 }
 0x2f6   : > { %v1178_v16 = vpop.eup %1177 }
 0x2f7   : > { %855 = vadd.xlane.f32.xlu1 %v1178_v16  ;;  %v1180_v17 = vpop.eup %1179 }
 0x2fb   : > { %857 = vadd.xlane.f32.xlu1 %v1180_v17 }
 0x384   : > { %v856_v18 = vpop.xlane.xlu1 %855 }
 0x385   : > { %1181 = vrcp.f32 %v856_v18 }
 0x388   : > { %v858_v19 = vpop.xlane.xlu1 %857 }
 0x389   : > { %1183 = vrcp.f32 %v858_v19 }
 0x38f   : > { %v1182_v20 = vpop.eup %1181 }
 0x390   : > { %v861_v21 = vmul.f32 %v1182_v20, %v1178_v16 }
 0x392   : > { %863 = vst [vmem:[%s399_s11] sm:$0xff] %v861_v21 }
 0x393   : > { %v1184_v22 = vpop.eup %1183 }
 0x394   : > { %v862_v23 = vmul.f32 %v1184_v22, %v1180_v17 }
 0x396   : > { %864 = vst [vmem:[%s399_s11 + $0x8] sm:$0xff] %v862_v23 }
 0x397   : > { %1198 = shalt.err (!%p1195_p5)
}
 0x398   : > { %s1199_s26 = scalar_lea.hbm %s1464_s20, 256  ;;  %s1203_s27 = scalar_lea.hbm %s1523_s9, 1024 }
 0x399   : > { %p1200_p6 = scmp.ne.s32.totalorder %s1464_s20, %s1199_s26  ;;  %p1204_p10 = scmp.lt.u32.totalorder %s1464_s20, %s1523_s9 }
 0x39a   : > { %p1205_p11 = scmp.lt.u32.totalorder %s1203_s27, %s1199_s26  ;;  %p1207_p13 = scmp.lt.u32.totalorder %s1199_s26, %s1464_s20 }
 0x39b   : > { %p1201_p7 = pnand %p1200_p6, %p1359_p4 }
 0x39c   : > { %p1206_p12 = por %p1205_p11, %p1204_p10 }
 0x39d   : > { %p1202_p9 = pneg %p1201_p7 }
 0x39e   : > { %p1208_p0 = por %p1207_p13, %p1206_p12 }
 0x3a0   : > { %p1209_p1 = pnand %p1208_p0, %p1202_p9 }
 0x3a2   : > { %1212 = shalt.err (!%p1209_p1)
}
 0x3a3   : > { %s1267_s11 = smov 128   ;;  %s1268_s18 = smov 8  }
 0x3a4   : > { %1116 = dma.vmem_to_hbm [thread:$0]  (%p1359_p4), %s1466_s16, 256, %s1464_s20, %s1468_s22, %s1267_s11, %s1267_s11, %s1268_s18  }
 0x3a5 PF: > { %p1122_p2 = scmp.ge.s32.totalorder %s1263_s14, 2  ;;  %s896_s17 = sand.u32 1, %s1243_s30  }
 0x3a6   : > { %s897_s23 = scalar_lea.sflag [#allocation4], %s896_s17 }
 0x3a7   : > { %p1119_p3 = pnand %p1122_p2, %p1366_p8 }
 0x3a9   : > { %1238 = dma.done.wait (!%p1119_p3), %s897_s23, 256  }
 0x3aa   : > { %1240 = vsyncadd (!%p1119_p3), %s897_s23, 4294967040  ;;  %s22_s14 = sadd.s32 1, %s1263_s14   ;;  %s1533_s12 = sld [smem:[#allocation6_spill]] }
 0x3ab   : > { %p19_p5 = scmp.ge.s32.totalorder %s22_s14, 6   ;;  %s1534_s11 = sld [smem:[#allocation9_spill]] }
 0x3ac   : > { %s1535_s24 = sld [smem:[#allocation7_spill]]  ;;  %s1536_s13 = sld [smem:[#allocation8_spill]] }
 0x3ad   : > { %s1537_s30 = smov %s1247_s10  ;;  %21 = sbr.rel (!%p19_p5) target bundleno = 4 (0x4), region = 104 }
 0x3b0   : > { %s1538_s10 = smov %s1533_s12 }
 0x3b2   : > { %s1539_s12 = smov %s1535_s24 }
 0x3b4   :  { %902 = vsyncpa [#allocation4], 1 }
 0x3b5   :  { %904 = vsyncpa [#allocation4 + $0x1], 1 }

</bundles_post_ra>
